<compile_context>
chip_gen: v7x
topology: tpu7x:2x2x1
jax: 0.10.0
libtpu: 0.0.40
codegen_flags: <defaults>
</compile_context>

<pallas_src>
import functools
import math
from typing import List, Literal

import jax
import jax.numpy as jnp
from jax.experimental import pallas as pl
from jax.experimental.pallas import tpu as pltpu


# ---------------------------------------------------------------------------
# Fused STSGCM kernel: all layers + crop + running max in one body, per batch tile.
# ---------------------------------------------------------------------------
def _stsgcm_kernel(*refs, num_nodes: int, num_layers: int, activation: str, fused_glu: bool):
    """refs = [adj, x_tile, <per-layer params...>, out_tile].

    Lane layout everywhere: column = local_batch * channels + channel.
      adj       : (M, M)                      compute dtype, VMEM-resident
      x_tile    : (M, Bt*Cin0)                compute dtype
      relu      : per layer [W (Bt*Cin, Bt*Cout),             b (1, Bt*Cout)   f32]
      glu fused : per layer [W (Bt*Cin, 2*Bt*Cout) = [a | g], b (1, 2*Bt*Cout) f32]
      glu split : per layer [Wa, ba, Wg, bg]
      out_tile  : (N, Bt*Cout_last)
    """
    per_layer = 2 if (activation == "relu" or fused_glu) else 4
    adj_ref, x_ref, o_ref = refs[0], refs[1], refs[-1]
    layer_refs = refs[2:2 + num_layers * per_layer]

    n = num_nodes
    adj = adj_ref[...]                               # (M, M)       compute dtype
    h = x_ref[...]                                   # (M, Bt*Cin)  compute dtype

    def conv(ax_c, base):
        """One GraphConvolution head on an already-aggregated slab (rows, Bt*Cin)."""
        if activation == "relu":
            w, b = layer_refs[base][...], layer_refs[base + 1][...]
            z = jnp.dot(ax_c, w, preferred_element_type=jnp.float32) + b
            return jnp.maximum(z, 0.0)
        if fused_glu:
            # One MXU push per layer; the a/g split is a 128-aligned static lane slice.
            w, b = layer_refs[base][...], layer_refs[base + 1][...]
            z = jnp.dot(ax_c, w, preferred_element_type=jnp.float32) + b
            half = z.shape[-1] // 2
            za, zg = z[:, :half], z[:, half:]
        else:
            wa, ba = layer_refs[base][...], layer_refs[base + 1][...]
            wg, bg = layer_refs[base + 2][...], layer_refs[base + 3][...]
            za = jnp.dot(ax_c, wa, preferred_element_type=jnp.float32) + ba
            zg = jnp.dot(ax_c, wg, preferred_element_type=jnp.float32) + bg
        return za * jax.nn.sigmoid(zg)               # f32 element-wise (v5e-safe); sigmoid on EUP

    running_max = None
    for layer in range(num_layers):                  # static unroll — L is small
        base = layer * per_layer
        last = layer == num_layers - 1
        # Graph aggregation for the whole batch tile in one MXU pass.
        ax = jnp.dot(adj, h, preferred_element_type=jnp.float32)       # (M, Bt*Cin) f32
        if last:
            # The last layer's full-M activation is never reused as `h`; crop rows
            # [N, 2N) BEFORE its weight matmuls (M = 4N -> 4x less MXU work).
            ax = ax[n:2 * n, :]
        act = conv(ax.astype(h.dtype), base)                            # f32, (rows, Bt*Cout)
        if last:
            if running_max is None:
                final = act
            else:
                # Single crop of the running max at the very end: one sublane slice
                # instead of one per layer (crop-then-max == max-then-crop elementwise).
                final = jnp.maximum(running_max[n:2 * n, :], act)
            o_ref[...] = final.astype(o_ref.dtype)                      # lane-dense store
        else:
            running_max = act if running_max is None else jnp.maximum(running_max, act)
            h = act.astype(h.dtype)


# ---------------------------------------------------------------------------
# Batch-tile selection: lane-dense tiles, small kron weights.
# ---------------------------------------------------------------------------
def choose_batch_tile(batch: int, cin0: int, cout_last: int) -> int:
    """Smallest Bt making Bt*Cin0 and Bt*Cout multiples of 128 (lane-dense x / output
    tiles, dense MXU).  Falls back to one full-batch tile (block == full array, also a
    legal BlockSpec) when the batch is too small to tile."""
    need_in = 128 // math.gcd(128, cin0)
    need_out = 128 // math.gcd(128, cout_last)
    bt = need_in * need_out // math.gcd(need_in, need_out)      # lcm
    return batch if bt >= batch else bt


# ---------------------------------------------------------------------------
# One-time parameter preparation (hoisted out of the forward path).
# ---------------------------------------------------------------------------
def prepare_stsgcm_params(params, activation: str, batch_tile: int,
                          compute_dtype=jnp.bfloat16):
    """Precompute the per-batch-tile block-diagonal weights kron(I_Bt, W) and lane-tiled
    biases used by the fused kernel.  Call ONCE; reuse the result for every forward."""
    Bt = int(batch_tile)
    cin0 = params[0][0].shape[0]
    couts = [w.shape[1] if activation == "relu" else w.shape[1] // 2 for (w, _) in params]
    cout = couts[-1]
    assert all(c == cout for c in couts), "torch.stack in the reference needs equal out-channels"
    fused_glu = (activation == "glu") and ((Bt * cout) % 128 == 0)

    eye = jnp.eye(Bt, dtype=jnp.float32)
    blk = lambda w: jnp.kron(eye, w.astype(jnp.float32)).astype(compute_dtype)
    tile_b = lambda b: jnp.tile(b.astype(jnp.float32), (Bt,)).reshape(1, -1)   # biases stay f32

    tensors = []
    for (w_t, b) in params:                     # w_t pre-transposed (Cin, F)
        if activation == "relu":
            tensors += [blk(w_t), tile_b(b)]
        elif fused_glu:
            c = w_t.shape[1] // 2
            tensors += [jnp.concatenate([blk(w_t[:, :c]), blk(w_t[:, c:])], axis=1),
                        jnp.concatenate([tile_b(b[:c]), tile_b(b[c:])], axis=1)]
        else:
            c = w_t.shape[1] // 2
            tensors += [blk(w_t[:, :c]), tile_b(b[:c]), blk(w_t[:, c:]), tile_b(b[c:])]

    return dict(tensors=tensors, activation=activation, batch_tile=Bt, cin0=cin0,
                cout=cout, num_layers=len(params), fused_glu=fused_glu,
                compute_dtype=compute_dtype)


# ---------------------------------------------------------------------------
# Forward wrapper: layout plumbing + one gridded pallas_call.
# ---------------------------------------------------------------------------
def stsgcm_forward(x, adjacency, prepared, num_nodes: int):
    """x: (B, 4*num_nodes, Cin0), adjacency: (4N, 4N) -> (B, num_nodes, Cout_last)."""
    B, M, cin0 = x.shape
    N = int(num_nodes)
    assert M == 4 * N and cin0 == prepared["cin0"]
    Bt, C = prepared["batch_tile"], prepared["cout"]
    cdt = prepared["compute_dtype"]
    tensors = prepared["tensors"]
    L = prepared["num_layers"]

    # Pad batch to a multiple of the batch tile (padded rows are dropped at the end;
    # the block-diagonal weights guarantee no cross-batch mixing).
    Bp = -(-B // Bt) * Bt
    if Bp != B:
        x = jnp.concatenate([x, jnp.zeros((Bp - B, M, cin0), x.dtype)], axis=0)

    # (B, M, Cin0) -> (M, B*Cin0): node-major sublanes, batch folded into lanes.
    # TODO(synk): at full STFGNN sizes, produce x in this HBM layout upstream and fold the
    # per-time-window STSGCM loop into this same grid so this transpose (and the output
    # transpose below) disappears and the weights stay resident across all windows.
    x2d = jnp.transpose(x, (1, 0, 2)).reshape(M, Bp * cin0).astype(cdt)
    adj = adjacency.astype(cdt)

    grid = (Bp // Bt,)
    # VMEM-resident operands: full-array blocks with a constant index_map -> loaded once,
    # no re-DMA across grid steps.
    resident = lambda a: pl.BlockSpec(a.shape, lambda b: (0, 0))

    # Scoped-VMEM budget: resident params + double-buffered x/out tiles + f32 intermediates.
    cbytes = jnp.dtype(cdt).itemsize
    obytes = jnp.dtype(x.dtype).itemsize
    resident_bytes = M * M * cbytes + sum(int(t.size) * jnp.dtype(t.dtype).itemsize for t in tensors)
    x_tile_bytes = M * Bt * cin0 * cbytes
    out_tile_bytes = N * Bt * C * obytes
    lane_w = max(int(t.shape[-1]) for t in tensors)
    interm_bytes = 8 * M * max(lane_w, Bt * cin0) * 4           # generous f32 intermediates
    est = 2 * (resident_bytes + x_tile_bytes + out_tile_bytes) + interm_bytes
    vmem_limit = int(min(64 * 2**20, max(32 * 2**20, est)))     # re-check per chip: v7x = 64 MiB phys

    kernel = functools.partial(_stsgcm_kernel, num_nodes=N, num_layers=L,
                               activation=prepared["activation"],
                               fused_glu=prepared["fused_glu"])

    out2d = pl.pallas_call(
        kernel,
        out_shape=jax.ShapeDtypeStruct((N, Bp * C), x.dtype),
        grid=grid,
        in_specs=[resident(adj),                                     # adjacency (resident)
                  pl.BlockSpec((M, Bt * cin0), lambda b: (0, b))]    # x batch tile (pipelined)
                 + [resident(t) for t in tensors],                   # weights/biases (resident)
        out_specs=pl.BlockSpec((N, Bt * C), lambda b: (0, b)),
        compiler_params=pltpu.CompilerParams(
            dimension_semantics=("parallel",),    # 2x on v7x (2 TCs); neutral on v5e/v6e
            vmem_limit_bytes=vmem_limit),
    )(adj, x2d, *tensors)

    # (N, Bp*C) -> (Bp, N, C), drop batch padding.
    return jnp.transpose(out2d.reshape(N, Bp, C), (1, 0, 2))[:B]


# ---------------------------------------------------------------------------
# Parameter init (PyTorch-Linear-like); weights stored pre-transposed (Cin, F).
# ---------------------------------------------------------------------------
def init_stsgcm_params(key, filters: List[int], activation: Literal["relu", "glu"]):
    params = []
    for cin, cout in zip(filters[:-1], filters[1:]):
        f = cout if activation == "relu" else 2 * cout
        key, k_w, k_b = jax.random.split(key, 3)
        bound = 1.0 / (cin ** 0.5)
        w_t = jax.random.uniform(k_w, (cin, f), jnp.float32, -bound, bound)
        b = jax.random.uniform(k_b, (f,), jnp.float32, -bound, bound)
        params.append((w_t, b))
    return params


# ---------------------------------------------------------------------------
# Pure-JAX reference (HIGHEST precision so it is a true f32 baseline).
# ---------------------------------------------------------------------------
def stsgcm_reference(x, adjacency, params, num_nodes, activation):
    hp = jax.lax.Precision.HIGHEST
    xs = []
    for (w_t, b) in params:
        y = jnp.einsum("mn,bnc->bmc", adjacency, x, precision=hp)
        z = jnp.einsum("bmc,cf->bmf", y, w_t, precision=hp) + b
        if activation == "relu":
            x = jnp.maximum(z, 0.0)
        else:
            c = w_t.shape[1] // 2
            x = z[..., :c] * jax.nn.sigmoid(z[..., c:])
        xs.append(x[:, num_nodes:2 * num_nodes, :])
    return jnp.max(jnp.stack(xs, axis=0), axis=0)


if __name__ == "__main__":
    key = jax.random.PRNGKey(0)
    k_xa, k_aa, k_xb, k_ab, k_p = jax.random.split(key, 5)

    # Config A — lane-dense + gridded: B=16 split into 2 parallel batch tiles of Bt=8,
    # num_nodes=16 (sublane-aligned crops), 16 channels -> 128-lane MXU operands & stores.
    nn_a, B_a, filters_a = 16, 16, [16, 16, 16, 16]
    M_a = 4 * nn_a
    x_a = jax.random.normal(k_xa, (B_a, M_a, filters_a[0]), jnp.float32)
    adj_a = jax.random.normal(k_aa, (M_a, M_a), jnp.float32) / (M_a ** 0.5)

    # Config B — tiny fallback (single full-batch tile, grid=1): exercises relu and the
    # non-fused GLU path with narrow, non-128 lanes (correct, just masked stores).
    nn_b, B_b, filters_b = 8, 2, [8, 16, 16]
    M_b = 4 * nn_b
    x_b = jax.random.normal(k_xb, (B_b, M_b, filters_b[0]), jnp.float32)
    adj_b = jax.random.normal(k_ab, (M_b, M_b), jnp.float32) / (M_b ** 0.5)

    for (x, adj, n_nodes, filt, acts) in (
            (x_a, adj_a, nn_a, filters_a, ("glu",)),
            (x_b, adj_b, nn_b, filters_b, ("glu", "relu"))):
        for activation in acts:
            params = init_stsgcm_params(k_p, filt, activation)
            ref = stsgcm_reference(x, adj, params, n_nodes, activation)
            scale = float(jnp.max(jnp.abs(ref))) + 1e-6
            bt = choose_batch_tile(x.shape[0], filt[0], filt[-1])
            # f32 = exact path (tight tol); bf16 = default MXU-operand path (loose tol).
            for cdt, tol in ((jnp.float32, 1e-3), (jnp.bfloat16, 8e-2)):
                prepared = prepare_stsgcm_params(params, activation, bt, compute_dtype=cdt)
                fwd = jax.jit(functools.partial(stsgcm_forward, prepared=prepared,
                                                num_nodes=n_nodes))
                out = jax.block_until_ready(fwd(x, adj))
                assert out.shape == ref.shape, (activation, out.shape, ref.shape)
                err = float(jnp.max(jnp.abs(out - ref)))
                assert err <= tol * scale + tol, (activation, str(cdt), err, scale)

    print("KERNEL_OK")
</pallas_src>

<mosaic_0001>
module attributes {stable_mosaic.version = 11 : i64} {
  func.func @_stsgcm_kernel(%arg0: i32, %arg1: memref<64x64xf32, #tpu.memory_space<vmem>>, %arg2: memref<64x128xf32, #tpu.memory_space<vmem>>, %arg3: memref<128x256xf32, #tpu.memory_space<vmem>>, %arg4: memref<1x256xf32, #tpu.memory_space<vmem>>, %arg5: memref<128x256xf32, #tpu.memory_space<vmem>>, %arg6: memref<1x256xf32, #tpu.memory_space<vmem>>, %arg7: memref<128x256xf32, #tpu.memory_space<vmem>>, %arg8: memref<1x256xf32, #tpu.memory_space<vmem>>, %arg9: memref<16x128xf32, #tpu.memory_space<vmem>>) attributes {dimension_semantics = [#tpu.dimension_semantics<parallel>], iteration_bounds = array<i64: 2>, scalar_prefetch = 0 : i64, scratch_operands = 0 : i64, tpu.core_type = #tpu.core_type<tc>, window_params = [{pipeline_mode = #tpu.pipeline_mode<synchronous>, transform_indices = @transform_0, window_bounds = array<i64: 64, 64>}, {transform_indices = @transform_1, window_bounds = array<i64: 64, 128>}, {pipeline_mode = #tpu.pipeline_mode<synchronous>, transform_indices = @transform_2, window_bounds = array<i64: 128, 256>}, {pipeline_mode = #tpu.pipeline_mode<synchronous>, transform_indices = @transform_3, window_bounds = array<i64: 1, 256>}, {pipeline_mode = #tpu.pipeline_mode<synchronous>, transform_indices = @transform_4, window_bounds = array<i64: 128, 256>}, {pipeline_mode = #tpu.pipeline_mode<synchronous>, transform_indices = @transform_5, window_bounds = array<i64: 1, 256>}, {pipeline_mode = #tpu.pipeline_mode<synchronous>, transform_indices = @transform_6, window_bounds = array<i64: 128, 256>}, {pipeline_mode = #tpu.pipeline_mode<synchronous>, transform_indices = @transform_7, window_bounds = array<i64: 1, 256>}, {transform_indices = @transform_8, window_bounds = array<i64: 16, 128>}]} {
    %c0 = arith.constant 0 : index
    %c0_0 = arith.constant 0 : index
    %0 = vector.load %arg1[%c0, %c0_0] : memref<64x64xf32, #tpu.memory_space<vmem>>, vector<64x64xf32>
    %c0_1 = arith.constant 0 : index
    %c0_2 = arith.constant 0 : index
    %1 = vector.load %arg2[%c0_1, %c0_2] : memref<64x128xf32, #tpu.memory_space<vmem>>, vector<64x128xf32>
    %cst = arith.constant dense<0.000000e+00> : vector<64x128xf32>
    %2 = tpu.matmul %0, %1, %cst {dimension_numbers = #tpu.dot_dimension_numbers<[1], [0], [0], [1], [0, 0, 1, 1], [], []>} : vector<64x64xf32>, vector<64x128xf32>, vector<64x128xf32> -> vector<64x128xf32>
    %c0_3 = arith.constant 0 : index
    %c0_4 = arith.constant 0 : index
    %3 = vector.load %arg3[%c0_3, %c0_4] : memref<128x256xf32, #tpu.memory_space<vmem>>, vector<128x256xf32>
    %c0_5 = arith.constant 0 : index
    %c0_6 = arith.constant 0 : index
    %4 = vector.load %arg4[%c0_5, %c0_6] : memref<1x256xf32, #tpu.memory_space<vmem>>, vector<1x256xf32>
    %cst_7 = arith.constant dense<0.000000e+00> : vector<64x256xf32>
    %5 = tpu.matmul %2, %3, %cst_7 {dimension_numbers = #tpu.dot_dimension_numbers<[1], [0], [0], [1], [0, 0, 1, 1], [], []>} : vector<64x128xf32>, vector<128x256xf32>, vector<64x256xf32> -> vector<64x256xf32>
    %6 = vector.broadcast %4 : vector<1x256xf32> to vector<64x256xf32>
    %7 = arith.addf %5, %6 : vector<64x256xf32>
    %8 = vector.extract_strided_slice %7 {offsets = [0, 0], sizes = [64, 128], strides = [1, 1]} : vector<64x256xf32> to vector<64x128xf32>
    %9 = vector.extract_strided_slice %7 {offsets = [0, 128], sizes = [64, 128], strides = [1, 1]} : vector<64x256xf32> to vector<64x128xf32>
    %10 = arith.negf %9 : vector<64x128xf32>
    %11 = math.exp %10 : vector<64x128xf32>
    %cst_8 = arith.constant 1.000000e+00 : f32
    %12 = vector.broadcast %cst_8 : f32 to vector<64x128xf32>
    %13 = arith.addf %12, %11 : vector<64x128xf32>
    %14 = arith.divf %12, %13 : vector<64x128xf32>
    %15 = arith.mulf %8, %14 : vector<64x128xf32>
    %cst_9 = arith.constant dense<0.000000e+00> : vector<64x128xf32>
    %16 = tpu.matmul %0, %15, %cst_9 {dimension_numbers = #tpu.dot_dimension_numbers<[1], [0], [0], [1], [0, 0, 1, 1], [], []>} : vector<64x64xf32>, vector<64x128xf32>, vector<64x128xf32> -> vector<64x128xf32>
    %c0_10 = arith.constant 0 : index
    %c0_11 = arith.constant 0 : index
    %17 = vector.load %arg5[%c0_10, %c0_11] : memref<128x256xf32, #tpu.memory_space<vmem>>, vector<128x256xf32>
    %c0_12 = arith.constant 0 : index
    %c0_13 = arith.constant 0 : index
    %18 = vector.load %arg6[%c0_12, %c0_13] : memref<1x256xf32, #tpu.memory_space<vmem>>, vector<1x256xf32>
    %cst_14 = arith.constant dense<0.000000e+00> : vector<64x256xf32>
    %19 = tpu.matmul %16, %17, %cst_14 {dimension_numbers = #tpu.dot_dimension_numbers<[1], [0], [0], [1], [0, 0, 1, 1], [], []>} : vector<64x128xf32>, vector<128x256xf32>, vector<64x256xf32> -> vector<64x256xf32>
    %20 = vector.broadcast %18 : vector<1x256xf32> to vector<64x256xf32>
    %21 = arith.addf %19, %20 : vector<64x256xf32>
    %22 = vector.extract_strided_slice %21 {offsets = [0, 0], sizes = [64, 128], strides = [1, 1]} : vector<64x256xf32> to vector<64x128xf32>
    %23 = vector.extract_strided_slice %21 {offsets = [0, 128], sizes = [64, 128], strides = [1, 1]} : vector<64x256xf32> to vector<64x128xf32>
    %24 = arith.negf %23 : vector<64x128xf32>
    %25 = math.exp %24 : vector<64x128xf32>
    %cst_15 = arith.constant 1.000000e+00 : f32
    %26 = vector.broadcast %cst_15 : f32 to vector<64x128xf32>
    %27 = arith.addf %26, %25 : vector<64x128xf32>
    %28 = arith.divf %26, %27 : vector<64x128xf32>
    %29 = arith.mulf %22, %28 : vector<64x128xf32>
    %30 = arith.maximumf %15, %29 : vector<64x128xf32>
    %cst_16 = arith.constant dense<0.000000e+00> : vector<64x128xf32>
    %31 = tpu.matmul %0, %29, %cst_16 {dimension_numbers = #tpu.dot_dimension_numbers<[1], [0], [0], [1], [0, 0, 1, 1], [], []>} : vector<64x64xf32>, vector<64x128xf32>, vector<64x128xf32> -> vector<64x128xf32>
    %32 = vector.extract_strided_slice %31 {offsets = [16, 0], sizes = [16, 128], strides = [1, 1]} : vector<64x128xf32> to vector<16x128xf32>
    %c0_17 = arith.constant 0 : index
    %c0_18 = arith.constant 0 : index
    %33 = vector.load %arg7[%c0_17, %c0_18] : memref<128x256xf32, #tpu.memory_space<vmem>>, vector<128x256xf32>
    %c0_19 = arith.constant 0 : index
    %c0_20 = arith.constant 0 : index
    %34 = vector.load %arg8[%c0_19, %c0_20] : memref<1x256xf32, #tpu.memory_space<vmem>>, vector<1x256xf32>
    %cst_21 = arith.constant dense<0.000000e+00> : vector<16x256xf32>
    %35 = tpu.matmul %32, %33, %cst_21 {dimension_numbers = #tpu.dot_dimension_numbers<[1], [0], [0], [1], [0, 0, 1, 1], [], []>} : vector<16x128xf32>, vector<128x256xf32>, vector<16x256xf32> -> vector<16x256xf32>
    %36 = vector.broadcast %34 : vector<1x256xf32> to vector<16x256xf32>
    %37 = arith.addf %35, %36 : vector<16x256xf32>
    %38 = vector.extract_strided_slice %37 {offsets = [0, 0], sizes = [16, 128], strides = [1, 1]} : vector<16x256xf32> to vector<16x128xf32>
    %39 = vector.extract_strided_slice %37 {offsets = [0, 128], sizes = [16, 128], strides = [1, 1]} : vector<16x256xf32> to vector<16x128xf32>
    %40 = arith.negf %39 : vector<16x128xf32>
    %41 = math.exp %40 : vector<16x128xf32>
    %cst_22 = arith.constant 1.000000e+00 : f32
    %42 = vector.broadcast %cst_22 : f32 to vector<16x128xf32>
    %43 = arith.addf %42, %41 : vector<16x128xf32>
    %44 = arith.divf %42, %43 : vector<16x128xf32>
    %45 = arith.mulf %38, %44 : vector<16x128xf32>
    %46 = vector.extract_strided_slice %30 {offsets = [16, 0], sizes = [16, 128], strides = [1, 1]} : vector<64x128xf32> to vector<16x128xf32>
    %47 = arith.maximumf %46, %45 : vector<16x128xf32>
    %c0_23 = arith.constant 0 : index
    %c0_24 = arith.constant 0 : index
    %48 = vector.load %arg9[%c0_23, %c0_24] : memref<16x128xf32, #tpu.memory_space<vmem>>, vector<16x128xf32>
    tpu.vector_store %arg9[%c0_23, %c0_24], %47 {strides = array<i32>} : memref<16x128xf32, #tpu.memory_space<vmem>>, vector<16x128xf32>,
    return
  }
  func.func @transform_0(%arg0: i32) -> (i32, i32) {
    %c0_i32 = arith.constant 0 : i32
    %c0_i32_0 = arith.constant 0 : i32
    %c0_i32_1 = arith.constant 0 : i32
    return %c0_i32, %c0_i32_0 : i32, i32
  }
  func.func @transform_1(%arg0: i32) -> (i32, i32) {
    %c0_i32 = arith.constant 0 : i32
    %c0_i32_0 = arith.constant 0 : i32
    return %c0_i32, %arg0 : i32, i32
  }
  func.func @transform_2(%arg0: i32) -> (i32, i32) {
    %c0_i32 = arith.constant 0 : i32
    %c0_i32_0 = arith.constant 0 : i32
    %c0_i32_1 = arith.constant 0 : i32
    return %c0_i32, %c0_i32_0 : i32, i32
  }
  func.func @transform_3(%arg0: i32) -> (i32, i32) {
    %c0_i32 = arith.constant 0 : i32
    %c0_i32_0 = arith.constant 0 : i32
    %c0_i32_1 = arith.constant 0 : i32
    return %c0_i32, %c0_i32_0 : i32, i32
  }
  func.func @transform_4(%arg0: i32) -> (i32, i32) {
    %c0_i32 = arith.constant 0 : i32
    %c0_i32_0 = arith.constant 0 : i32
    %c0_i32_1 = arith.constant 0 : i32
    return %c0_i32, %c0_i32_0 : i32, i32
  }
  func.func @transform_5(%arg0: i32) -> (i32, i32) {
    %c0_i32 = arith.constant 0 : i32
    %c0_i32_0 = arith.constant 0 : i32
    %c0_i32_1 = arith.constant 0 : i32
    return %c0_i32, %c0_i32_0 : i32, i32
  }
  func.func @transform_6(%arg0: i32) -> (i32, i32) {
    %c0_i32 = arith.constant 0 : i32
    %c0_i32_0 = arith.constant 0 : i32
    %c0_i32_1 = arith.constant 0 : i32
    return %c0_i32, %c0_i32_0 : i32, i32
  }
  func.func @transform_7(%arg0: i32) -> (i32, i32) {
    %c0_i32 = arith.constant 0 : i32
    %c0_i32_0 = arith.constant 0 : i32
    %c0_i32_1 = arith.constant 0 : i32
    return %c0_i32, %c0_i32_0 : i32, i32
  }
  func.func @transform_8(%arg0: i32) -> (i32, i32) {
    %c0_i32 = arith.constant 0 : i32
    %c0_i32_0 = arith.constant 0 : i32
    return %c0_i32, %arg0 : i32, i32
  }
}

</mosaic_0001>

<bundles_post_ra>
// kernel: stsgcm_forward.1
= control target key start
LH: loop header
LB: loop body
LE: loop exit
PB: predicated region body
PF: predicated region fallthrough
CT: control target
= control target key end

     0   :  { %13 = vsyncpa [#allocation4], 0  ;;  %s2404_s0 = inlined_call_operand.vmem [shape: f32[64,64], index: 0, kind: input, shape index: {}]   ;;  %s2405_s1 = inlined_call_operand.vmem [shape: f32[64,256], index: 1, kind: input, shape index: {}]   ;;  %s2406_s2 = inlined_call_operand.hbm [shape: f32[128,256], index: 2, kind: input, shape index: {}]   ;;  %s2407_s3 = inlined_call_operand.vmem [shape: f32[1,256], index: 3, kind: input, shape index: {}]   ;;  %s2408_s4 = inlined_call_operand.hbm [shape: f32[128,256], index: 4, kind: input, shape index: {}]   ;;  %s2409_s5 = inlined_call_operand.vmem [shape: f32[1,256], index: 5, kind: input, shape index: {}]   ;;  %s2410_s6 = inlined_call_operand.vmem [shape: f32[128,256], index: 6, kind: input, shape index: {}]   ;;  %s2411_s7 = inlined_call_operand.vmem [shape: f32[1,256], index: 7, kind: input, shape index: {}]   ;;  %s2412_s8 = inlined_call_operand.vmem [shape: f32[16,256], index: 8, kind: output, shape index: {}]  }
   0x1   :  { %14 = vsyncpa [#allocation6], 0  ;;  %s2025_s27 = smov 0   ;;  %s2027_s28 = smov 0  }
   0x2   :  { %s2029_s29 = smov 0  }
   0x3 LB: > { %s2041_s30 = sadd.s32 4294967295, %s1973_s29   ;;  %s2044_s9 = sadd.s32 1, %s1973_s29   ;;  %s1973_s29 = sphi %s2029_s29, %s2430_s29   ;;  %s1969_s28 = sphi %s2027_s28, %s2429_s28   ;;  %s1965_s27 = sphi %s2025_s27, %s2428_s27  }
   0x4   : > { %s45_s10 = ssub.s32 %s1973_s29, %s2044_s9  ;;  %s48_s11 = sadd.s32 1, %s1969_s28 }
   0x5   : > { %p46_p0 = scmp.eq.s32.totalorder %s45_s10, 0  ;;  %p55_p1 = scmp.ne.s32.totalorder %s1969_s28, %s1965_s27 }
   0x6   : > { %p56_p2 = scmp.eq.s32.totalorder %s1973_s29, 0  ;;  %p211_p3 = scmp.eq.s32.totalorder %s2041_s30, 1 }
   0x7   : > { %s2054_s12 = scalar_select %p46_p0, %s1969_s28, %s48_s11  }
   0x8   : > { %p2056_p4 = por %p56_p2, %p55_p1  ;;  %p2060_p5 = por %p211_p3, %p55_p1 }
   0x9   : > { %2415 = sst [smem:[#allocation10_spill]] %s2054_s12  ;;  %p1434_p6 = scmp.ge.s32.totalorder %s1973_s29, 1 }
   0xa   : > { %s2416_s13 = scalar_select %p2056_p4, 1, 0 }
   0xb   : > { %s2417_s14 = scalar_select %p2060_p5, 1, 0 }
   0xc   : > { %p224_p7 = scmp.lt.s32.totalorder %s1973_s29, 3  ;;  %p2413_p8 = scmp.eq.s32.totalorder %s2041_s30, 0 }
   0xd   : > { %s1975_s16 = smov [#allocation3]   ;;  %s1976_s19 = smov [#allocation5]  }
   0xe   : > { %p2067_p9 = pnand %p1434_p6, %p224_p7  ;;  %s239_s17 = sshll.u32 %s1975_s16, 4  ;;  %s240_s17 = int_to_ptr.vmem [resolvable:$true] %s239_s17 }
   0xf   : > { %s255_s20 = sshll.u32 %s1976_s19, 4  ;;  %s1887_s23 = scalar_lea.hbm %s2406_s2, 4096  ;;  %s2079_s20 = int_to_ptr.vmem [resolvable:$true] %s255_s20 }
  0x10   : > { %s2418_s15 = scalar_select %p2067_p9, 1, 0 }
  0x11   : > { %p1775_p10 = pneg %p2067_p9  ;;  %p1888_p12 = scmp.ne.s32.totalorder %s2406_s2, %s1887_s23 }
  0x12   : > { %p1894_p2 = scmp.lt.u32.totalorder %s1887_s23, %s2406_s2 }
  0x13   : > { %p2075_p11 = pnand %p2413_p8, %p1775_p10 }
  0x15   : > { %p1889_p13 = pneg %p2075_p11 }
  0x17   : > { %p1890_p0 = pnand %p1889_p13, %p1888_p12 }
  0x19   : > { %p1891_p1 = pneg %p1890_p0 }
  0x1b   : > { %p1896_p3 = pnand %p1894_p2, %p1891_p1 }
  0x1d   : > { %1899 = shalt.err (!%p1896_p3)
}
  0x1e   : > { %s1900_s11 = scalar_lea.vmem %s240_s17, 4096  ;;  %p1908_p8 = scmp.lt.s32.totalorder %s240_s17, %s240_s17 }
  0x1f   : > { %p1901_p6 = scmp.ne.s32.totalorder %s240_s17, %s1900_s11  ;;  %p1909_p5 = scmp.lt.s32.totalorder %s1900_s11, %s1900_s11 }
  0x21   : > { %p1903_p7 = pnand %p1901_p6, %p1889_p13  ;;  %p1910_p9 = por %p1909_p5, %p1908_p8 }
  0x23   : > { %p1904_p10 = pneg %p1903_p7 }
  0x25   : > { %p1911_p4 = pnand %p1910_p9, %p1904_p10 }
  0x27   : > { %1914 = shalt.err (!%p1911_p4)
}
  0x28   : > { %s1977_s16 = smov 256   ;;  %s1978_s19 = smov 16  }
  0x29   : > { %1778 = dma.hbm_to_vmem [thread:$0]  (!%p2075_p11), %s2406_s2, 4096, %s240_s17, [#allocation4], %s1977_s16, %s1977_s16, %s1978_s19  }
  0x2a   : > { %s1915_s25 = scalar_lea.hbm %s2408_s4, 4096 }
  0x2b   : > { %p1916_p12 = scmp.ne.s32.totalorder %s2408_s4, %s1915_s25  ;;  %p1922_p8 = scmp.lt.u32.totalorder %s1915_s25, %s2408_s4 }
  0x2d   : > { %p1918_p4 = pnand %p1916_p12, %p1889_p13 }
  0x2f   : > { %p1919_p5 = pneg %p1918_p4 }
  0x31   : > { %p1924_p9 = pnand %p1922_p8, %p1919_p5 }
  0x33   : > { %1927 = shalt.err (!%p1924_p9)
}
  0x34   : > { %s1928_s17 = scalar_lea.vmem %s2079_s20, 4096  ;;  %p1936_p3 = scmp.lt.s32.totalorder %s2079_s20, %s2079_s20 }
  0x35   : > { %p1929_p0 = scmp.ne.s32.totalorder %s2079_s20, %s1928_s17  ;;  %p1937_p6 = scmp.lt.s32.totalorder %s1928_s17, %s1928_s17 }
  0x37   : > { %p1931_p1 = pnand %p1929_p0, %p1889_p13  ;;  %p1938_p7 = por %p1937_p6, %p1936_p3 }
  0x39   : > { %p1932_p2 = pneg %p1931_p1 }
  0x3b   : > { %p1939_p10 = pnand %p1938_p7, %p1932_p2 }
  0x3d   : > { %1942 = shalt.err (!%p1939_p10)
}
  0x3e   : > { %1781 = dma.hbm_to_vmem [thread:$0]  (!%p2075_p11), %s2408_s4, 4096, %s2079_s20, [#allocation6], %s1977_s16, %s1977_s16, %s1978_s19  }
  0x3f   : > { %p1437_p12 = scmp.ge.s32.totalorder %s1973_s29, 2 }
  0x40   : > { %p2420_p4 = scmp.ne.s32.totalorder (!%p1437_p12), %s2416_s13, 0 }
  0x41   : > { %274 = sbr.rel (%p1437_p12) target bundleno = 80 (0x50), region = 44 }
  0x48   : > { %277 = sbr.rel (!%p2420_p4) target bundleno = 80 (0x50), region = 48  ;;  %s279_s22 = sand.u32 (%p2420_p4), 1, %s1969_s28  }
  0x49   : > { %s1439_s23 = sshll.u32 (%p2420_p4), %s1973_s29, 3  ;;  %s1438_s24 = sshll.u32 (%p2420_p4), %s279_s22, 6 }
  0x4a   : > { %s283_s18 = scalar_lea.vmem (%p2420_p4), %s2405_s1, %s1439_s23  ;;  %s281_s10 = scalar_lea.vmem (%p2420_p4), [#allocation2], %s1438_s24 }
  0x4b   : > { %v325_v0 = vld [vmem:[%s283_s18] sm:$0xff] (%p2420_p4)  ;;  %v327_v1 = vld [vmem:[%s283_s18 + $0x10] sm:$0xff] (%p2420_p4) }
  0x4c   : > { %v329_v2 = vld [vmem:[%s283_s18 + $0x20] sm:$0xff] (%p2420_p4)  ;;  %326 = vst [vmem:[%s281_s10] sm:$0xff] (%p2420_p4), %v325_v0  ;;  %328 = vst [vmem:[%s281_s10 + $0x8] sm:$0xff] (%p2420_p4), %v327_v1  ;;  %v331_v3 = vld [vmem:[%s283_s18 + $0x30] sm:$0xff] (%p2420_p4) }
  0x4d   : > { %330 = vst [vmem:[%s281_s10 + $0x10] sm:$0xff] (%p2420_p4), %v329_v2  ;;  %v333_v4 = vld [vmem:[%s283_s18 + $0x40] sm:$0xff] (%p2420_p4)  ;;  %v335_v5 = vld [vmem:[%s283_s18 + $0x50] sm:$0xff] (%p2420_p4)  ;;  %332 = vst [vmem:[%s281_s10 + $0x18] sm:$0xff] (%p2420_p4), %v331_v3 }
  0x4e   : > { %334 = vst [vmem:[%s281_s10 + $0x20] sm:$0xff] (%p2420_p4), %v333_v4  ;;  %336 = vst [vmem:[%s281_s10 + $0x28] sm:$0xff] (%p2420_p4), %v335_v5  ;;  %v337_v6 = vld [vmem:[%s283_s18 + $0x60] sm:$0xff] (%p2420_p4)  ;;  %v339_v7 = vld [vmem:[%s283_s18 + $0x70] sm:$0xff] (%p2420_p4) }
  0x4f   : > { %338 = vst [vmem:[%s281_s10 + $0x30] sm:$0xff] %v337_v6  ;;  %340 = vst [vmem:[%s281_s10 + $0x38] sm:$0xff] %v339_v7 }
  0x50 PF: > { %p2421_p11 = scmp.ne.s32.totalorder %s2418_s15, 0 }
  0x51   : > { %s352_s29 = sand.u32 (!%p2421_p11), 1, %s1965_s27   ;;  %p2422_p13 = scmp.eq.s32.totalorder (!%p2421_p11), %s2041_s30, 0 }
  0x52   : > { %349 = sbr.rel (%p2421_p11) target bundleno = 1568 (0x620), region = 86  ;;  %s1441_s13 = sshll.u32 (!%p2421_p11), %s352_s29, 6 }
  0x53   : > { %s354_s20 = scalar_lea.vmem (!%p2421_p11), [#allocation2], %s1441_s13 }
  0x59   : > { %1956 = dma.done.wait (%p2422_p13), [#allocation4], 4096   ;;  %p2423_p5 = pmov %p2422_p13 }
  0x5b   : > { %1958 = vsyncadd (%p2423_p5), [#allocation4], 4294963200  ;;  %p2424_p8 = pmov %p2423_p5 }
  0x5c   : > { %p2425_p9 = pmov %p2423_p5 }
  0x5d   : > { %1960 = dma.done.wait (%p2424_p8), [#allocation6], 4096  }
  0x5e   : > { %1962 = vsyncadd (%p2425_p9), [#allocation6], 4294963200  ;;  %v400_v8 = vld [vmem:[%s354_s20] sm:$0xff]  ;;  %v401_v9 = vld [vmem:[%s354_s20 + $0x8] sm:$0xff]  ;;  %vm408_vm0 = vcmask 523264   ;;  %s1444_s21 = sshll.u32 %s352_s29, 4 }
  0x5f   : > { %v402_v10 = vld [vmem:[%s354_s20 + $0x10] sm:$0xff]  ;;  %v1623_v11 = vpack.c.bf16 %v401_v9, %v400_v8  ;;  %v403_v12 = vld [vmem:[%s354_s20 + $0x18] sm:$0xff]  ;;  %v404_v14 = vld [vmem:[%s354_s20 + $0x20] sm:$0xff]  ;;  %s391_s22 = scalar_lea.vmem [#allocation7], %s1444_s21  ;;  %p2426_p0 = scmp.ne.s32.totalorder %s2417_s14, 0 }
  0x60   : > { %v1627_v13 = vpack.c.bf16 %v403_v12, %v402_v10  ;;  %v405_v15 = vld [vmem:[%s354_s20 + $0x28] sm:$0xff]  ;;  %v2152_v16 = vld [vmem:[%s2404_s0] sm:$0xff]  ;;  %v406_v18 = vld [vmem:[%s354_s20 + $0x30] sm:$0xff]  ;;  %v1979_v12 = vmov 0.0   ;;  %s1488_s27 = sshll.u32 (%p2426_p0), %s2041_s30, 3 }
  0x61   : > { %1624 = vmatprep.subr.bf16.mxu1 %v1623_v11  ;;  %1555 = vmatprep.mubr.msk.f32.mxu1 %vm408_vm0, %v2152_v16  ;;  %v1631_v17 = vpack.c.bf16 %v405_v15, %v404_v14  ;;  %v407_v19 = vld [vmem:[%s354_s20 + $0x38] sm:$0xff]  ;;  %v539_v21 = vld [vmem:[#allocation3 + $0x8] sm:$0xff]  ;;  %v538_v24 = vld [vmem:[#allocation3] sm:$0xff]  ;;  %s1317_s24 = scalar_lea.vmem (%p2426_p0), %s2412_s8, %s1488_s27 }
  0x62   : > { %1626 = vmatpush3.bf16.msra.mxu1 %v1623_v11  ;;  %1583 = vmatprep.mubr.msk.f32.mxu0 %vm408_vm0, %v2152_v16  ;;  %v1635_v20 = vpack.c.bf16 %v407_v19, %v406_v18  ;;  %v541_v22 = vld [vmem:[#allocation3 + $0x18] sm:$0xff]  ;;  %v540_v25 = vld [vmem:[#allocation3 + $0x10] sm:$0xff]  ;;  %v543_v26 = vld [vmem:[#allocation3 + $0x28] sm:$0xff] }
  0x63   : > { %1628 = vmatprep.subr.bf16.mxu1 %v1627_v13  ;;  %v1639_v23 = vpack.c.bf16 %v541_v22, %v539_v21  ;;  %v545_v27 = vld [vmem:[#allocation3 + $0x38] sm:$0xff]  ;;  %v2161_v28 = vld [vmem:[%s2404_s0 + $0x8] sm:$0xff]  ;;  %v1641_v29 = vpack.c.bf16 %v540_v25, %v538_v24  ;;  %v2166_v30 = vld [vmem:[%s2404_s0 + $0x10] sm:$0xff]  ;;  %v572_v22 = vlaneseq }
  0x64   : > { %v1643_v31 = vpack.c.bf16 %v545_v27, %v543_v26  ;;  %v542_v32 = vld [vmem:[#allocation3 + $0x20] sm:$0xff]  ;;  %v544_v33 = vld [vmem:[#allocation3 + $0x30] sm:$0xff]  ;;  %v547_v34 = vld [vmem:[#allocation3 + $0x48] sm:$0xff] }
  0x65   : > { %v549_v35 = vld [vmem:[#allocation3 + $0x58] sm:$0xff]  ;;  %v1645_v37 = vpack.c.bf16 %v544_v33, %v542_v32  ;;  %v2180_v38 = vld [vmem:[%s2404_s0 + $0x20] sm:$0xff]  ;;  %v548_v41 = vld [vmem:[#allocation3 + $0x50] sm:$0xff] }
  0x66   : > { %1630 = vmatpush3.bf16.msra.mxu1 %v1627_v13  ;;  %v2175_v36 = vld [vmem:[%s2404_s0 + $0x18] sm:$0xff]  ;;  %v1647_v39 = vpack.c.bf16 %v549_v35, %v547_v34  ;;  %v546_v40 = vld [vmem:[#allocation3 + $0x40] sm:$0xff]  ;;  %v551_v42 = vld [vmem:[#allocation3 + $0x68] sm:$0xff] }
  0x67   : > { %1632 = vmatprep.subr.bf16.mxu1 %v1631_v17  ;;  %v553_v43 = vld [vmem:[#allocation3 + $0x78] sm:$0xff]  ;;  %v2189_v44 = vld [vmem:[%s2404_s0 + $0x28] sm:$0xff]  ;;  %v1649_v45 = vpack.c.bf16 %v548_v41, %v546_v40  ;;  %v2194_v46 = vld [vmem:[%s2404_s0 + $0x30] sm:$0xff] }
  0x68   : > { %v1651_v47 = vpack.c.bf16 %v553_v43, %v551_v42  ;;  %v550_v48 = vld [vmem:[#allocation3 + $0x60] sm:$0xff]  ;;  %v552_v49 = vld [vmem:[#allocation3 + $0x70] sm:$0xff]  ;;  %v555_v50 = vld [vmem:[#allocation3 + $0x88] sm:$0xff] }
  0x69   : > { %v557_v51 = vld [vmem:[#allocation3 + $0x98] sm:$0xff]  ;;  %v1653_v53 = vpack.c.bf16 %v552_v49, %v550_v48  ;;  %v554_v55 = vld [vmem:[#allocation3 + $0x80] sm:$0xff]  ;;  %v556_v56 = vld [vmem:[#allocation3 + $0x90] sm:$0xff] }
  0x6a   : > { %1634 = vmatpush3.bf16.msra.mxu1 %v1631_v17  ;;  %v2203_v52 = vld [vmem:[%s2404_s0 + $0x38] sm:$0xff]  ;;  %v1655_v54 = vpack.c.bf16 %v557_v51, %v555_v50  ;;  %v559_v57 = vld [vmem:[#allocation3 + $0xa8] sm:$0xff]  ;;  %v1657_v59 = vpack.c.bf16 %v556_v56, %v554_v55  ;;  %v558_v61 = vld [vmem:[#allocation3 + $0xa0] sm:$0xff] }
  0x6b   : > { %1636 = vmatprep.subr.bf16.mxu1 %v1635_v20  ;;  %v561_v58 = vld [vmem:[#allocation3 + $0xb8] sm:$0xff]  ;;  %v560_v62 = vld [vmem:[#allocation3 + $0xb0] sm:$0xff]  ;;  %v563_v63 = vld [vmem:[#allocation3 + $0xc8] sm:$0xff] }
  0x6c   : > { %v1659_v60 = vpack.c.bf16 %v561_v58, %v559_v57  ;;  %v565_v0 = vld [vmem:[#allocation3 + $0xd8] sm:$0xff]  ;;  %v1661_v1 = vpack.c.bf16 %v560_v62, %v558_v61  ;;  %v562_v3 = vld [vmem:[#allocation3 + $0xc0] sm:$0xff]  ;;  %v564_v4 = vld [vmem:[#allocation3 + $0xd0] sm:$0xff] }
  0x6d   : > { %v1663_v2 = vpack.c.bf16 %v565_v0, %v563_v63  ;;  %v567_v5 = vld [vmem:[#allocation3 + $0xe8] sm:$0xff]  ;;  %v569_v6 = vld [vmem:[#allocation3 + $0xf8] sm:$0xff]  ;;  %v1665_v7 = vpack.c.bf16 %v564_v4, %v562_v3  ;;  %v566_v9 = vld [vmem:[#allocation3 + $0xe0] sm:$0xff] }
  0x6e   : > { %1638 = vmatpush3.bf16.msra.mxu1 %v1635_v20  ;;  %v1667_v8 = vpack.c.bf16 %v569_v6, %v567_v5  ;;  %v568_v10 = vld [vmem:[#allocation3 + $0xf0] sm:$0xff]  ;;  %v570_v25 = vld [vmem:[%s2407_s3] sm:$0x3] }
  0x6f   : > { %1640 = vmatprep.subr.bf16.mxu1 %v1639_v23  ;;  %v1669_v11 = vpack.c.bf16 %v568_v10, %v566_v9  ;;  %v573_v23 = vshrl.u32 %v572_v22, 7 }
  0x71   : > { %1556 = vmatmul.mubr.msk.f32.vlgmr.msra.gmra.mrb[0].mxu1 %vm408_vm0, %v2161_v28  ;;  %v2217_v24 = vsub.s32 1, %v573_v23  ;;  %v2223_v55 = vsub.s32 0, %v573_v23 }
  0x72   : > { %1558 = vmatprep.mubr.msk.f32.mxu1 %vm408_vm0, %v2166_v30  ;;  %1642 = vmatpush1.bf16.msra.mxu1 %v1641_v29 }
  0x73   : > { %1644 = vmatprep.subr.bf16.mxu1 %v1643_v31  ;;  %v579_v26 = vrot.slane %v570_v25, %v2217_v24  ;;  %v575_v62 = vrot.slane %v570_v25, %v2223_v55 }
  0x75   : > { %1559 = vmatmul.mubr.msk.f32.gmra.mrb[2].mxu1 %vm408_vm0, %v2175_v36 }
  0x76   : > { %1561 = vmatprep.mubr.msk.f32.mxu1 %vm408_vm0, %v2180_v38  ;;  %1646 = vmatpush1.bf16.msra.mxu1 %v1645_v37 }
  0x77   : > { %1648 = vmatprep.subr.bf16.mxu1 %v1647_v39 }
  0x79   : > { %1562 = vmatmul.mubr.msk.f32.gmra.mrb[4].mxu1 %vm408_vm0, %v2189_v44 }
  0x7a   : > { %1564 = vmatprep.mubr.msk.f32.mxu1 %vm408_vm0, %v2194_v46  ;;  %1650 = vmatpush1.bf16.msra.mxu1 %v1649_v45 }
  0x7b   : > { %1652 = vmatprep.subr.bf16.mxu1 %v1651_v47 }
  0x7d   : > { %1565 = vmatmul.mubr.msk.f32.gmra.mrb[6].mxu1 %vm408_vm0, %v2203_v52 }
  0x7e   : > { %1654 = vmatpush1.bf16.msra.mxu1 %v1653_v53  ;;  %646 = vmatprep.mubr.f32.mxu1 %v1979_v12 }
  0x7f   : > { %1656 = vmatprep.subr.bf16.mxu1 %v1655_v54 }
  0x82   : > { %1658 = vmatpush1.bf16.msra.mxu1 %v1657_v59 }
  0x83   : > { %1660 = vmatprep.subr.bf16.mxu1 %v1659_v60 }
  0x86   : > { %1662 = vmatpush1.bf16.msra.mxu1 %v1661_v1 }
  0x87   : > { %1664 = vmatprep.subr.bf16.mxu1 %v1663_v2 }
  0x8a   : > { %1666 = vmatpush1.bf16.msra.mxu1 %v1665_v7 }
  0x8b   : > { %1668 = vmatprep.subr.bf16.mxu1 %v1667_v8 }
  0x8e   : > { %1670 = vmatpush1.bf16.msra.mxu1 %v1669_v11 }
 0x144   : > { %v1557_v13 = vpop.f32.mrb[0].mxu1 }
 0x145   : > { %v499_v14 = vpop.f32.mrb[1].mxu1 }
 0x146   : > { %647 = vmatmul.mubr.f32.vlgmr.msra.gmra.mrb[8].mxu1 %v499_v14 }
 0x147   : > { %652 = vmatprep.mubr.f32.mxu1 %v1979_v12 }
 0x148   : > { %v1560_v15 = vpop.f32.mrb[2].mxu1 }
 0x149   : > { %v509_v17 = vpop.f32.mrb[3].mxu1 }
 0x14a   : > { %653 = vmatmul.mubr.f32.gmra.mrb[10].mxu1 %v1557_v13 }
 0x14b   : > { %658 = vmatprep.mubr.f32.mxu1 %v1979_v12 }
 0x14c   : > { %v1563_v18 = vpop.f32.mrb[4].mxu1 }
 0x14d   : > { %v519_v19 = vpop.f32.mrb[5].mxu1 }
 0x14e   : > { %659 = vmatmul.mubr.f32.gmra.mrb[12].mxu1 %v509_v17 }
 0x14f   : > { %664 = vmatprep.mubr.f32.mxu1 %v1979_v12 }
 0x150   : > { %v1566_v20 = vpop.f32.mrb[6].mxu1 }
 0x151   : > { %v529_v21 = vpop.f32.mrb[7].mxu1 }
 0x152   : > { %665 = vmatmul.mubr.f32.gmra.mrb[14].mxu1 %v1560_v15 }
 0x153   : > { %670 = vmatprep.mubr.f32.mxu1 %v1979_v12 }
 0x156   : > { %671 = vmatmul.mubr.f32.gmra.mrb[16].mxu1 %v519_v19 }
 0x157   : > { %676 = vmatprep.mubr.f32.mxu1 %v1979_v12 }
 0x15a   : > { %677 = vmatmul.mubr.f32.gmra.mrb[18].mxu1 %v1563_v18 }
 0x15b   : > { %682 = vmatprep.mubr.f32.mxu1 %v1979_v12 }
 0x15e   : > { %683 = vmatmul.mubr.f32.gmra.mrb[20].mxu1 %v529_v21 }
 0x15f   : > { %688 = vmatprep.mubr.f32.mxu1 %v1979_v12 }
 0x162   : > { %689 = vmatmul.mubr.f32.gmra.mrb[22].mxu1 %v1566_v20 }
 0x163   : > { %1611 = vmatprep.mubr.msk.f32.mxu1 %vm408_vm0, %v2152_v16 }
 0x219   : > { %v648_v27 = vpop.f32.mrb[8].mxu1 }
 0x21a   : > { %v650_v29 = vpop.f32.mrb[9].mxu1  ;;  %v649_v5 = vadd.f32 %v648_v27, %v575_v62 }
 0x21b   : > { %v651_v31 = vadd.f32 %v650_v29, %v579_v26 }
 0x21d   : > { %v1453_v32 = vmul.f32 -1.442695, %v651_v31  ;;  %v654_v33 = vpop.f32.mrb[10].mxu1 }
 0x21e   : > { %v656_v34 = vpop.f32.mrb[11].mxu1  ;;  %v655_v15 = vadd.f32 %v654_v33, %v575_v62 }
 0x21f   : > { %1815 = vpow2.f32 %v1453_v32  ;;  %v657_v35 = vadd.f32 %v656_v34, %v579_v26 }
 0x221   : > { %v1454_v37 = vmul.f32 -1.442695, %v657_v35  ;;  %v660_v16 = vpop.f32.mrb[12].mxu1 }
 0x222   : > { %v662_v39 = vpop.f32.mrb[13].mxu1  ;;  %v661_v22 = vadd.f32 %v660_v16, %v575_v62 }
 0x223   : > { %1817 = vpow2.f32 %v1454_v37  ;;  %v663_v40 = vadd.f32 %v662_v39, %v579_v26 }
 0x225   : > { %v1455_v41 = vmul.f32 -1.442695, %v663_v40  ;;  %v666_v42 = vpop.f32.mrb[14].mxu1 }
 0x226   : > { %v668_v43 = vpop.f32.mrb[15].mxu1  ;;  %v667_v31 = vadd.f32 %v666_v42, %v575_v62 }
 0x227   : > { %1819 = vpow2.f32 %v1455_v41  ;;  %v669_v45 = vadd.f32 %v668_v43, %v579_v26 }
 0x229   : > { %v1816_v47 = vpop.eup %1815  ;;  %v1456_v48 = vmul.f32 -1.442695, %v669_v45  ;;  %v672_v49 = vpop.f32.mrb[16].mxu1 }
 0x22a   : > { %v719_v50 = vadd.f32 1.0, %v1816_v47  ;;  %v674_v51 = vpop.f32.mrb[17].mxu1  ;;  %v673_v37 = vadd.f32 %v672_v49, %v575_v62 }
 0x22b   : > { %1821 = vpow2.f32 %v1456_v48  ;;  %v675_v53 = vadd.f32 %v674_v51, %v579_v26 }
 0x22c   : > { %1823 = vrcp.f32 %v719_v50 }
 0x22d   : > { %v1818_v54 = vpop.eup %1817  ;;  %v1457_v56 = vmul.f32 -1.442695, %v675_v53  ;;  %v678_v57 = vpop.f32.mrb[18].mxu1 }
 0x22e   : > { %v720_v58 = vadd.f32 1.0, %v1818_v54  ;;  %v680_v59 = vpop.f32.mrb[19].mxu1  ;;  %v679_v43 = vadd.f32 %v678_v57, %v575_v62  ;;  %v857_v54 = vld [vmem:[#allocation5 + $0x8] sm:$0xff] }
 0x22f   : > { %1825 = vpow2.f32 %v1457_v56  ;;  %v681_v60 = vadd.f32 %v680_v59, %v579_v26  ;;  %v859_v56 = vld [vmem:[#allocation5 + $0x18] sm:$0xff] }
 0x230   : > { %1827 = vrcp.f32 %v720_v58 }
 0x231   : > { %v1820_v61 = vpop.eup %1819  ;;  %v1458_v63 = vmul.f32 -1.442695, %v681_v60  ;;  %v684_v0 = vpop.f32.mrb[20].mxu1  ;;  %v1687_v60 = vpack.c.bf16 %v859_v56, %v857_v54 }
 0x232   : > { %v721_v1 = vadd.f32 1.0, %v1820_v61  ;;  %v686_v2 = vpop.f32.mrb[21].mxu1  ;;  %v685_v42 = vadd.f32 %v684_v0, %v575_v62  ;;  %v856_v61 = vld [vmem:[#allocation5] sm:$0xff] }
 0x233   : > { %1829 = vpow2.f32 %v1458_v63  ;;  %v687_v3 = vadd.f32 %v686_v2, %v579_v26  ;;  %v858_v63 = vld [vmem:[#allocation5 + $0x10] sm:$0xff]  ;;  %v863_v2 = vld [vmem:[#allocation5 + $0x38] sm:$0xff] }
 0x234   : > { %1831 = vrcp.f32 %v721_v1  ;;  %v861_v1 = vld [vmem:[#allocation5 + $0x28] sm:$0xff]  ;;  %v1689_v57 = vpack.c.bf16 %v858_v63, %v856_v61 }
 0x235   : > { %v1822_v4 = vpop.eup %1821  ;;  %v1459_v6 = vmul.f32 -1.442695, %v687_v3  ;;  %v690_v7 = vpop.f32.mrb[22].mxu1  ;;  %v1691_v0 = vpack.c.bf16 %v863_v2, %v861_v1  ;;  %v860_v3 = vld [vmem:[#allocation5 + $0x20] sm:$0xff]  ;;  %v1171_v63 = vld [vmem:[%s2410_s6 + $0x8] sm:$0xff]  ;;  %v1173_v1 = vld [vmem:[%s2410_s6 + $0x18] sm:$0xff] }
 0x236   : > { %v1824_v8 = vpop.eup %1823  ;;  %v722_v9 = vadd.f32 1.0, %v1822_v4  ;;  %v692_v10 = vpop.f32.mrb[23].mxu1  ;;  %v691_v53 = vadd.f32 %v690_v7, %v575_v62  ;;  %v862_v4 = vld [vmem:[#allocation5 + $0x30] sm:$0xff]  ;;  %v1170_v2 = vld [vmem:[%s2410_s6] sm:$0xff] }
 0x237   : > { %1833 = vpow2.f32 %v1459_v6  ;;  %v693_v11 = vadd.f32 %v692_v10, %v579_v26  ;;  %v743_v13 = vmul.f32 %v1824_v8, %v649_v5  ;;  %v865_v5 = vld [vmem:[#allocation5 + $0x48] sm:$0xff]  ;;  %v867_v6 = vld [vmem:[#allocation5 + $0x58] sm:$0xff]  ;;  %v1693_v62 = vpack.c.bf16 %v862_v4, %v860_v3  ;;  %v864_v8 = vld [vmem:[#allocation5 + $0x40] sm:$0xff] }
 0x238   : > { %1835 = vrcp.f32 %v722_v9  ;;  %v1695_v7 = vpack.c.bf16 %v867_v6, %v865_v5  ;;  %v866_v9 = vld [vmem:[#allocation5 + $0x50] sm:$0xff]  ;;  %v869_v10 = vld [vmem:[#allocation5 + $0x68] sm:$0xff]  ;;  %v1177_v4 = vld [vmem:[%s2410_s6 + $0x38] sm:$0xff] }
 0x239   : > { %v1826_v14 = vpop.eup %1825  ;;  %v1460_v17 = vmul.f32 -1.442695, %v693_v11  ;;  %v871_v11 = vld [vmem:[#allocation5 + $0x78] sm:$0xff]  ;;  %v1175_v3 = vld [vmem:[%s2410_s6 + $0x28] sm:$0xff] }
 0x23a   : > { %v1828_v18 = vpop.eup %1827  ;;  %v723_v19 = vadd.f32 1.0, %v1826_v14  ;;  %v1699_v14 = vpack.c.bf16 %v871_v11, %v869_v10  ;;  %v1739_v6 = vpack.c.bf16 %v1177_v4, %v1175_v3 }
 0x23b   : > { %1837 = vpow2.f32 %v1460_v17  ;;  %v744_v20 = vmul.f32 %v1828_v18, %v655_v15  ;;  %v868_v15 = vld [vmem:[#allocation5 + $0x60] sm:$0xff]  ;;  %v870_v17 = vld [vmem:[#allocation5 + $0x70] sm:$0xff]  ;;  %v873_v18 = vld [vmem:[#allocation5 + $0x88] sm:$0xff] }
 0x23c   : > { %1839 = vrcp.f32 %v723_v19  ;;  %v875_v19 = vld [vmem:[#allocation5 + $0x98] sm:$0xff] }
 0x23d   : > { %v1830_v21 = vpop.eup %1829  ;;  %v1671_v23 = vpack.c.bf16 %v744_v20, %v743_v13  ;;  %v1697_v13 = vpack.c.bf16 %v866_v9, %v864_v8  ;;  %v1701_v20 = vpack.c.bf16 %v870_v17, %v868_v15  ;;  %v1179_v8 = vld [vmem:[%s2410_s6 + $0x48] sm:$0xff]  ;;  %v1181_v9 = vld [vmem:[%s2410_s6 + $0x58] sm:$0xff] }
 0x23e   : > { %v1832_v25 = vpop.eup %1831  ;;  %v724_v27 = vadd.f32 1.0, %v1830_v21  ;;  %v1703_v21 = vpack.c.bf16 %v875_v19, %v873_v18  ;;  %v1743_v11 = vpack.c.bf16 %v1181_v9, %v1179_v8  ;;  %v1183_v15 = vld [vmem:[%s2410_s6 + $0x68] sm:$0xff]  ;;  %v1185_v17 = vld [vmem:[%s2410_s6 + $0x78] sm:$0xff] }
 0x23f   : > { %1672 = vmatprep.subr.bf16.mxu0 %v1671_v23  ;;  %v2226_v29 = vmul.f32 %v1832_v25, %v661_v22  ;;  %v872_v22 = vld [vmem:[#allocation5 + $0x80] sm:$0xff]  ;;  %v877_v25 = vld [vmem:[#allocation5 + $0xa8] sm:$0xff]  ;;  %v1747_v19 = vpack.c.bf16 %v1185_v17, %v1183_v15 }
 0x240   : > { %1841 = vrcp.f32 %v724_v27  ;;  %1674 = vmatpush3.bf16.msra.mxu0 %v1671_v23  ;;  %v874_v23 = vld [vmem:[#allocation5 + $0x90] sm:$0xff]  ;;  %v879_v27 = vld [vmem:[#allocation5 + $0xb8] sm:$0xff] }
 0x241   : > { %v1834_v26 = vpop.eup %1833 }
 0x242   : > { %v1836_v32 = vpop.eup %1835  ;;  %v725_v33 = vadd.f32 1.0, %v1834_v26  ;;  %v1705_v26 = vpack.c.bf16 %v874_v23, %v872_v22  ;;  %v1187_v22 = vld [vmem:[%s2410_s6 + $0x88] sm:$0xff]  ;;  %v1189_v23 = vld [vmem:[%s2410_s6 + $0x98] sm:$0xff] }
 0x243   : > { %v2228_v34 = vmul.f32 %v1836_v32, %v667_v31  ;;  %v1707_v31 = vpack.c.bf16 %v879_v27, %v877_v25  ;;  %v876_v32 = vld [vmem:[#allocation5 + $0xa0] sm:$0xff]  ;;  %v1751_v27 = vpack.c.bf16 %v1189_v23, %v1187_v22 }
 0x244   : > { %1843 = vrcp.f32 %v725_v33  ;;  %v878_v33 = vld [vmem:[#allocation5 + $0xb0] sm:$0xff] }
 0x245   : > { %v1838_v35 = vpop.eup %1837  ;;  %v1675_v16 = vpack.c.bf16 %v2228_v34, %v2226_v29 }
 0x246   : > { %v1840_v39 = vpop.eup %1839  ;;  %v726_v40 = vadd.f32 1.0, %v1838_v35  ;;  %v881_v35 = vld [vmem:[#allocation5 + $0xc8] sm:$0xff] }
 0x247   : > { %1676 = vmatprep.subr.bf16.mxu0 %v1675_v16  ;;  %v747_v41 = vmul.f32 %v1840_v39, %v673_v37  ;;  %v883_v37 = vld [vmem:[#allocation5 + $0xd8] sm:$0xff] }
 0x248   : > { %1845 = vrcp.f32 %v726_v40  ;;  %1678 = vmatpush3.bf16.msra.mxu0 %v1675_v16  ;;  %v1709_v16 = vpack.c.bf16 %v878_v33, %v876_v32  ;;  %v1711_v39 = vpack.c.bf16 %v883_v37, %v881_v35  ;;  %v880_v40 = vld [vmem:[#allocation5 + $0xc0] sm:$0xff]  ;;  %v1191_v32 = vld [vmem:[%s2410_s6 + $0xa8] sm:$0xff]  ;;  %v1193_v33 = vld [vmem:[%s2410_s6 + $0xb8] sm:$0xff] }
 0x249   : > { %v1755_v37 = vpack.c.bf16 %v1193_v33, %v1191_v32 }
 0x24a   : > { %v1842_v45 = vpop.eup %1841 }
 0x24b   : > { %v748_v47 = vmul.f32 %v1842_v45, %v679_v43  ;;  %v885_v43 = vld [vmem:[#allocation5 + $0xe8] sm:$0xff]  ;;  %v887_v45 = vld [vmem:[#allocation5 + $0xf8] sm:$0xff] }
 0x24d   : > { %v1679_v48 = vpack.c.bf16 %v748_v47, %v747_v41  ;;  %v882_v41 = vld [vmem:[#allocation5 + $0xd0] sm:$0xff] }
 0x24e   : > { %v1844_v50 = vpop.eup %1843  ;;  %v1713_v47 = vpack.c.bf16 %v882_v41, %v880_v40  ;;  %v1195_v40 = vld [vmem:[%s2410_s6 + $0xc8] sm:$0xff]  ;;  %v1197_v41 = vld [vmem:[%s2410_s6 + $0xd8] sm:$0xff] }
 0x24f   : > { %1680 = vmatprep.subr.bf16.mxu0 %v1679_v48  ;;  %v749_v51 = vmul.f32 %v1844_v50, %v685_v42  ;;  %v1715_v42 = vpack.c.bf16 %v887_v45, %v885_v43  ;;  %v886_v50 = vld [vmem:[#allocation5 + $0xf0] sm:$0xff]  ;;  %v1759_v45 = vpack.c.bf16 %v1197_v41, %v1195_v40 }
 0x250   : > { %1682 = vmatpush3.bf16.msra.mxu0 %v1679_v48  ;;  %v884_v48 = vld [vmem:[#allocation5 + $0xe0] sm:$0xff] }
 0x252   : > { %v1846_v49 = vpop.eup %1845 }
 0x253   : > { %v750_v58 = vmul.f32 %v1846_v49, %v691_v53 }
 0x255   : > { %v1683_v59 = vpack.c.bf16 %v750_v58, %v749_v51  ;;  %v1717_v51 = vpack.c.bf16 %v886_v50, %v884_v48  ;;  %v888_v50 = vld [vmem:[%s2409_s5] sm:$0x3] }
 0x257   : > { %1684 = vmatprep.subr.bf16.mxu0 %v1683_v59 }
 0x258   : > { %1686 = vmatpush3.bf16.msra.mxu0 %v1683_v59 }
 0x259   : > { %1688 = vmatprep.subr.bf16.mxu0 %v1687_v60 }
 0x25b   : > { %1584 = vmatmul.mubr.msk.f32.vlgmr.msra.gmra.mrb[0].mxu0 %vm408_vm0, %v2161_v28 }
 0x25c   : > { %1586 = vmatprep.mubr.msk.f32.mxu0 %vm408_vm0, %v2166_v30  ;;  %1690 = vmatpush1.bf16.msra.mxu0 %v1689_v57  ;;  %v1735_v57 = vpack.c.bf16 %v1173_v1, %v1171_v63 }
 0x25d   : > { %1692 = vmatprep.subr.bf16.mxu0 %v1691_v0  ;;  %v1172_v0 = vld [vmem:[%s2410_s6 + $0x10] sm:$0xff] }
 0x25e   : > { %v1737_v5 = vpack.c.bf16 %v1172_v0, %v1170_v2 }
 0x25f   : > { %1587 = vmatmul.mubr.msk.f32.gmra.mrb[2].mxu0 %vm408_vm0, %v2175_v36 }
 0x260   : > { %1589 = vmatprep.mubr.msk.f32.mxu0 %vm408_vm0, %v2180_v38  ;;  %1694 = vmatpush1.bf16.msra.mxu0 %v1693_v62  ;;  %v1174_v62 = vld [vmem:[%s2410_s6 + $0x20] sm:$0xff] }
 0x261   : > { %1696 = vmatprep.subr.bf16.mxu0 %v1695_v7  ;;  %v1176_v7 = vld [vmem:[%s2410_s6 + $0x30] sm:$0xff] }
 0x262   : > { %v1741_v10 = vpack.c.bf16 %v1176_v7, %v1174_v62 }
 0x263   : > { %1590 = vmatmul.mubr.msk.f32.gmra.mrb[4].mxu0 %vm408_vm0, %v2189_v44 }
 0x264   : > { %1592 = vmatprep.mubr.msk.f32.mxu0 %vm408_vm0, %v2194_v46  ;;  %1698 = vmatpush1.bf16.msra.mxu0 %v1697_v13  ;;  %v1178_v13 = vld [vmem:[%s2410_s6 + $0x40] sm:$0xff] }
 0x265   : > { %1700 = vmatprep.subr.bf16.mxu0 %v1699_v14  ;;  %v1180_v14 = vld [vmem:[%s2410_s6 + $0x50] sm:$0xff] }
 0x266   : > { %v1745_v18 = vpack.c.bf16 %v1180_v14, %v1178_v13 }
 0x267   : > { %1593 = vmatmul.mubr.msk.f32.gmra.mrb[6].mxu0 %vm408_vm0, %v2203_v52 }
 0x268   : > { %1702 = vmatpush1.bf16.msra.mxu0 %v1701_v20  ;;  %964 = vmatprep.mubr.f32.mxu0 %v1979_v12  ;;  %v1182_v20 = vld [vmem:[%s2410_s6 + $0x60] sm:$0xff] }
 0x269   : > { %1704 = vmatprep.subr.bf16.mxu0 %v1703_v21  ;;  %v1184_v21 = vld [vmem:[%s2410_s6 + $0x70] sm:$0xff] }
 0x26a   : > { %v1749_v25 = vpack.c.bf16 %v1184_v21, %v1182_v20 }
 0x26c   : > { %1706 = vmatpush1.bf16.msra.mxu0 %v1705_v26  ;;  %v1186_v26 = vld [vmem:[%s2410_s6 + $0x80] sm:$0xff] }
 0x26d   : > { %1708 = vmatprep.subr.bf16.mxu0 %v1707_v31  ;;  %v1188_v31 = vld [vmem:[%s2410_s6 + $0x90] sm:$0xff] }
 0x26e   : > { %v1753_v35 = vpack.c.bf16 %v1188_v31, %v1186_v26 }
 0x270   : > { %1710 = vmatpush1.bf16.msra.mxu0 %v1709_v16  ;;  %v1190_v16 = vld [vmem:[%s2410_s6 + $0xa0] sm:$0xff] }
 0x271   : > { %1712 = vmatprep.subr.bf16.mxu0 %v1711_v39  ;;  %v1192_v39 = vld [vmem:[%s2410_s6 + $0xb0] sm:$0xff] }
 0x272   : > { %v1757_v43 = vpack.c.bf16 %v1192_v39, %v1190_v16 }
 0x274   : > { %1714 = vmatpush1.bf16.msra.mxu0 %v1713_v47  ;;  %v1194_v47 = vld [vmem:[%s2410_s6 + $0xc0] sm:$0xff] }
 0x275   : > { %1716 = vmatprep.subr.bf16.mxu0 %v1715_v42  ;;  %v1196_v42 = vld [vmem:[%s2410_s6 + $0xd0] sm:$0xff] }
 0x276   : > { %v1761_v48 = vpack.c.bf16 %v1196_v42, %v1194_v47 }
 0x278   : > { %1718 = vmatpush1.bf16.msra.mxu0 %v1717_v51  ;;  %v897_v51 = vrot.slane %v888_v50, %v2217_v24 }
 0x279   : > { %1736 = vmatprep.subr.bf16.mxu0 %v1735_v57 }
 0x32e   : > { %v1585_v53 = vpop.f32.mrb[0].mxu0 }
 0x32f   : > { %v817_v49 = vpop.f32.mrb[1].mxu0 }
 0x330   : > { %965 = vmatmul.mubr.f32.vlgmr.msra.gmra.mrb[8].mxu0 %v817_v49 }
 0x331   : > { %970 = vmatprep.mubr.f32.mxu0 %v1979_v12  ;;  %1738 = vmatpush1.bf16.msra.mxu0 %v1737_v5 }
 0x332   : > { %v1588_v54 = vpop.f32.mrb[2].mxu0  ;;  %1740 = vmatprep.subr.bf16.mxu0 %v1739_v6 }
 0x333   : > { %v827_v56 = vpop.f32.mrb[3].mxu0 }
 0x334   : > { %971 = vmatmul.mubr.f32.gmra.mrb[10].mxu0 %v1585_v53 }
 0x335   : > { %976 = vmatprep.mubr.f32.mxu0 %v1979_v12  ;;  %1742 = vmatpush1.bf16.msra.mxu0 %v1741_v10 }
 0x336   : > { %v1591_v58 = vpop.f32.mrb[4].mxu0  ;;  %1744 = vmatprep.subr.bf16.mxu0 %v1743_v11 }
 0x337   : > { %v837_v59 = vpop.f32.mrb[5].mxu0 }
 0x338   : > { %977 = vmatmul.mubr.f32.gmra.mrb[12].mxu0 %v827_v56 }
 0x339   : > { %982 = vmatprep.mubr.f32.mxu0 %v1979_v12  ;;  %1746 = vmatpush1.bf16.msra.mxu0 %v1745_v18 }
 0x33a   : > { %v1594_v60 = vpop.f32.mrb[6].mxu0  ;;  %1748 = vmatprep.subr.bf16.mxu0 %v1747_v19  ;;  %v893_v19 = vrot.slane %v888_v50, %v2223_v55 }
 0x33b   : > { %v847_v61 = vpop.f32.mrb[7].mxu0 }
 0x33c   : > { %983 = vmatmul.mubr.f32.gmra.mrb[14].mxu0 %v1588_v54 }
 0x33d   : > { %988 = vmatprep.mubr.f32.mxu0 %v1979_v12  ;;  %1750 = vmatpush1.bf16.msra.mxu0 %v1749_v25 }
 0x33e   : > { %1752 = vmatprep.subr.bf16.mxu0 %v1751_v27 }
 0x340   : > { %989 = vmatmul.mubr.f32.gmra.mrb[16].mxu0 %v837_v59 }
 0x341   : > { %994 = vmatprep.mubr.f32.mxu0 %v1979_v12  ;;  %1754 = vmatpush1.bf16.msra.mxu0 %v1753_v35 }
 0x342   : > { %1756 = vmatprep.subr.bf16.mxu0 %v1755_v37 }
 0x344   : > { %995 = vmatmul.mubr.f32.gmra.mrb[18].mxu0 %v1591_v58 }
 0x345   : > { %1000 = vmatprep.mubr.f32.mxu0 %v1979_v12  ;;  %1758 = vmatpush1.bf16.msra.mxu0 %v1757_v43 }
 0x346   : > { %1760 = vmatprep.subr.bf16.mxu0 %v1759_v45 }
 0x348   : > { %1001 = vmatmul.mubr.f32.gmra.mrb[20].mxu0 %v847_v61 }
 0x349   : > { %1006 = vmatprep.mubr.f32.mxu0 %v1979_v12  ;;  %1762 = vmatpush1.bf16.msra.mxu0 %v1761_v48 }
 0x34c   : > { %1007 = vmatmul.mubr.f32.gmra.mrb[22].mxu0 %v1594_v60 }
 0x34d   : > { %1278 = vmatprep.mubr.f32.mxu0 %v1979_v12 }
 0x403   : > { %v966_v53 = vpop.f32.mrb[8].mxu0 }
 0x404   : > { %v968_v49 = vpop.f32.mrb[9].mxu0  ;;  %v967_v26 = vadd.f32 %v966_v53, %v893_v19 }
 0x405   : > { %v969_v54 = vadd.f32 %v968_v49, %v897_v51 }
 0x407   : > { %v1469_v56 = vmul.f32 -1.442695, %v969_v54  ;;  %v972_v58 = vpop.f32.mrb[10].mxu0 }
 0x408   : > { %v974_v59 = vpop.f32.mrb[11].mxu0  ;;  %v973_v41 = vadd.f32 %v972_v58, %v893_v19 }
 0x409   : > { %1847 = vpow2.f32 %v1469_v56  ;;  %v975_v60 = vadd.f32 %v974_v59, %v897_v51 }
 0x40b   : > { %v1470_v61 = vmul.f32 -1.442695, %v975_v60  ;;  %v978_v63 = vpop.f32.mrb[12].mxu0 }
 0x40c   : > { %v980_v1 = vpop.f32.mrb[13].mxu0  ;;  %v979_v50 = vadd.f32 %v978_v63, %v893_v19 }
 0x40d   : > { %1849 = vpow2.f32 %v1470_v61  ;;  %v981_v2 = vadd.f32 %v980_v1, %v897_v51 }
 0x40f   : > { %v1471_v57 = vmul.f32 -1.442695, %v981_v2  ;;  %v984_v0 = vpop.f32.mrb[14].mxu0 }
 0x410   : > { %v986_v3 = vpop.f32.mrb[15].mxu0  ;;  %v985_v59 = vadd.f32 %v984_v0, %v893_v19 }
 0x411   : > { %1851 = vpow2.f32 %v1471_v57  ;;  %v987_v4 = vadd.f32 %v986_v3, %v897_v51 }
 0x413   : > { %v1848_v5 = vpop.eup %1847  ;;  %v1472_v6 = vmul.f32 -1.442695, %v987_v4  ;;  %v990_v62 = vpop.f32.mrb[16].mxu0 }
 0x414   : > { %v1037_v7 = vadd.f32 1.0, %v1848_v5  ;;  %v992_v8 = vpop.f32.mrb[17].mxu0  ;;  %v991_v2 = vadd.f32 %v990_v62, %v893_v19 }
 0x415   : > { %1853 = vpow2.f32 %v1472_v6  ;;  %v993_v9 = vadd.f32 %v992_v8, %v897_v51 }
 0x416   : > { %1855 = vrcp.f32 %v1037_v7 }
 0x417   : > { %v1850_v10 = vpop.eup %1849  ;;  %v1473_v11 = vmul.f32 -1.442695, %v993_v9  ;;  %v996_v13 = vpop.f32.mrb[18].mxu0 }
 0x418   : > { %v1038_v14 = vadd.f32 1.0, %v1850_v10  ;;  %v998_v15 = vpop.f32.mrb[19].mxu0  ;;  %v997_v5 = vadd.f32 %v996_v13, %v893_v19 }
 0x419   : > { %1857 = vpow2.f32 %v1473_v11  ;;  %v999_v17 = vadd.f32 %v998_v15, %v897_v51 }
 0x41a   : > { %1859 = vrcp.f32 %v1038_v14 }
 0x41b   : > { %v1852_v18 = vpop.eup %1851  ;;  %v1474_v20 = vmul.f32 -1.442695, %v999_v17  ;;  %v1002_v21 = vpop.f32.mrb[20].mxu0 }
 0x41c   : > { %v1039_v22 = vadd.f32 1.0, %v1852_v18  ;;  %v1004_v23 = vpop.f32.mrb[21].mxu0  ;;  %v1003_v0 = vadd.f32 %v1002_v21, %v893_v19 }
 0x41d   : > { %1861 = vpow2.f32 %v1474_v20  ;;  %v1005_v25 = vadd.f32 %v1004_v23, %v897_v51  ;;  %v1202_v23 = vld [vmem:[%s2411_s7] sm:$0x3] }
 0x41e   : > { %1863 = vrcp.f32 %v1039_v22 }
 0x41f   : > { %v1854_v27 = vpop.eup %1853  ;;  %v1475_v31 = vmul.f32 -1.442695, %v1005_v25  ;;  %v1008_v32 = vpop.f32.mrb[22].mxu0  ;;  %v1211_v25 = vrot.slane %v1202_v23, %v2217_v24 }
 0x420   : > { %v1856_v33 = vpop.eup %1855  ;;  %v1040_v35 = vadd.f32 1.0, %v1854_v27  ;;  %v1010_v37 = vpop.f32.mrb[23].mxu0  ;;  %v1009_v11 = vadd.f32 %v1008_v32, %v893_v19 }
 0x421   : > { %1865 = vpow2.f32 %v1475_v31  ;;  %v1011_v16 = vadd.f32 %v1010_v37, %v897_v51  ;;  %v1061_v39 = vmul.f32 %v1856_v33, %v967_v26 }
 0x422   : > { %1867 = vrcp.f32 %v1040_v35 }
 0x423   : > { %v1858_v40 = vpop.eup %1857  ;;  %v1476_v43 = vmul.f32 -1.442695, %v1011_v16 }
 0x424   : > { %v1860_v45 = vpop.eup %1859  ;;  %v1041_v47 = vadd.f32 1.0, %v1858_v40 }
 0x425   : > { %1869 = vpow2.f32 %v1476_v43  ;;  %v1062_v42 = vmul.f32 %v1860_v45, %v973_v41  ;;  %v1207_v43 = vrot.slane %v1202_v23, %v2223_v55 }
 0x426   : > { %1871 = vrcp.f32 %v1041_v47 }
 0x427   : > { %v1862_v48 = vpop.eup %1861  ;;  %v1719_v53 = vpack.c.bf16 %v1062_v42, %v1061_v39 }
 0x428   : > { %v1864_v49 = vpop.eup %1863  ;;  %v1042_v54 = vadd.f32 1.0, %v1862_v48 }
 0x429   : > { %1720 = vmatprep.subr.bf16.mxu1 %v1719_v53  ;;  %v2344_v56 = vmul.f32 %v1864_v49, %v979_v50 }
 0x42a   : > { %1873 = vrcp.f32 %v1042_v54  ;;  %1722 = vmatpush3.bf16.msra.mxu1 %v1719_v53 }
 0x42b   : > { %v1866_v51 = vpop.eup %1865  ;;  %v1069_v47 = vmax.f32 %v2226_v29, %v2344_v56 }
 0x42c   : > { %v1868_v60 = vpop.eup %1867  ;;  %v1043_v58 = vadd.f32 1.0, %v1866_v51 }
 0x42d   : > { %v2346_v61 = vmul.f32 %v1868_v60, %v985_v59 }
 0x42e   : > { %1875 = vrcp.f32 %v1043_v58 }
 0x42f   : > { %v1870_v1 = vpop.eup %1869  ;;  %v1723_v63 = vpack.c.bf16 %v2346_v61, %v2344_v56  ;;  %v1070_v49 = vmax.f32 %v2228_v34, %v2346_v61 }
 0x430   : > { %v1872_v57 = vpop.eup %1871  ;;  %v1044_v3 = vadd.f32 1.0, %v1870_v1 }
 0x431   : > { %1724 = vmatprep.subr.bf16.mxu1 %v1723_v63  ;;  %v1065_v4 = vmul.f32 %v1872_v57, %v991_v2 }
 0x432   : > { %1877 = vrcp.f32 %v1044_v3  ;;  %1726 = vmatpush3.bf16.msra.mxu1 %v1723_v63 }
 0x434   : > { %v1874_v6 = vpop.eup %1873 }
 0x435   : > { %v1066_v7 = vmul.f32 %v1874_v6, %v997_v5 }
 0x437   : > { %v1727_v8 = vpack.c.bf16 %v1066_v7, %v1065_v4 }
 0x438   : > { %v1876_v9 = vpop.eup %1875 }
 0x439   : > { %1728 = vmatprep.subr.bf16.mxu1 %v1727_v8  ;;  %v1067_v10 = vmul.f32 %v1876_v9, %v1003_v0 }
 0x43a   : > { %1730 = vmatpush3.bf16.msra.mxu1 %v1727_v8 }
 0x43c   : > { %v1878_v62 = vpop.eup %1877 }
 0x43d   : > { %v1068_v14 = vmul.f32 %v1878_v62, %v1009_v11 }
 0x43f   : > { %v1731_v15 = vpack.c.bf16 %v1068_v14, %v1067_v10 }
 0x441   : > { %1732 = vmatprep.subr.bf16.mxu1 %v1731_v15 }
 0x442   : > { %1734 = vmatpush3.bf16.msra.mxu1 %v1731_v15 }
 0x445   : > { %1612 = vmatmul.mubr.msk.f32.vlgmr.msra.gmra.mrb[24].mxu1 %vm408_vm0, %v2161_v28  ;;  %v1199_v28 = vld [vmem:[%s2410_s6 + $0xe8] sm:$0xff] }
 0x446   : > { %1614 = vmatprep.mubr.msk.f32.mxu1 %vm408_vm0, %v2166_v30  ;;  %v1201_v30 = vld [vmem:[%s2410_s6 + $0xf8] sm:$0xff] }
 0x449   : > { %1615 = vmatmul.mubr.msk.f32.gmra.mrb[26].mxu1 %vm408_vm0, %v2175_v36  ;;  %v1763_v36 = vpack.c.bf16 %v1201_v30, %v1199_v28 }
 0x44a   : > { %1617 = vmatprep.mubr.msk.f32.mxu1 %vm408_vm0, %v2180_v38  ;;  %v1198_v38 = vld [vmem:[%s2410_s6 + $0xe0] sm:$0xff] }
 0x44b   : > { %1764 = vmatprep.subr.bf16.mxu0 %v1763_v36 }
 0x44d   : > { %1618 = vmatmul.mubr.msk.f32.gmra.mrb[28].mxu1 %vm408_vm0, %v2189_v44  ;;  %v1200_v44 = vld [vmem:[%s2410_s6 + $0xf0] sm:$0xff] }
 0x44e   : > { %1620 = vmatprep.mubr.msk.f32.mxu1 %vm408_vm0, %v2194_v46  ;;  %v1765_v46 = vpack.c.bf16 %v1200_v44, %v1198_v38 }
 0x450   : > { %1766 = vmatpush1.bf16.msra.mxu0 %v1765_v46 }
 0x451   : > { %1621 = vmatmul.mubr.msk.f32.gmra.mrb[30].mxu1 %vm408_vm0, %v2203_v52 }
 0x518   : > { %v1613_v52 = vpop.f32.mrb[24].mxu1 }
 0x519   : > { %v1137_v13 = vpop.f32.mrb[25].mxu1 }
 0x51c   : > { %v1616_v17 = vpop.f32.mrb[26].mxu1 }
 0x51d   : > { %v1145_v18 = vpop.f32.mrb[27].mxu1 }
 0x51e   : > { %1279 = vmatmul.mubr.f32.vlgmr.msra.gmra.mrb[24].mxu0 %v1145_v18 }
 0x51f   : > { %1284 = vmatprep.mubr.f32.mxu0 %v1979_v12 }
 0x520   : > { %v1619_v19 = vpop.f32.mrb[28].mxu1 }
 0x521   : > { %v1155_v20 = vpop.f32.mrb[29].mxu1 }
 0x522   : > { %1285 = vmatmul.mubr.f32.gmra.mrb[26].mxu0 %v1616_v17 }
 0x524   : > { %v1622_v21 = vpop.f32.mrb[30].mxu1 }
 0x525   : > { %v1163_v22 = vpop.f32.mrb[31].mxu1 }
 0x5f1   : > { %v1280_v27 = vpop.f32.mrb[24].mxu0 }
 0x5f2   : > { %v1282_v26 = vpop.f32.mrb[25].mxu0  ;;  %v1281_v24 = vadd.f32 %v1280_v27, %v1207_v43 }
 0x5f3   : > { %v1283_v31 = vadd.f32 %v1282_v26, %v1211_v25 }
 0x5f5   : > { %v1485_v32 = vmul.f32 -1.442695, %v1283_v31  ;;  %v1286_v33 = vpop.f32.mrb[26].mxu0 }
 0x5f6   : > { %v1288_v35 = vpop.f32.mrb[27].mxu0  ;;  %v1287_v50 = vadd.f32 %v1286_v33, %v1207_v43 }
 0x5f7   : > { %1879 = vpow2.f32 %v1485_v32  ;;  %v1289_v12 = vadd.f32 %v1288_v35, %v1211_v25 }
 0x5f9   : > { %v1486_v37 = vmul.f32 -1.442695, %v1289_v12 }
 0x5fb   : > { %1881 = vpow2.f32 %v1486_v37 }
 0x601   : > { %v1880_v16 = vpop.eup %1879 }
 0x602   : > { %v1297_v39 = vadd.f32 1.0, %v1880_v16 }
 0x604   : > { %1883 = vrcp.f32 %v1297_v39 }
 0x605   : > { %v1882_v40 = vpop.eup %1881 }
 0x606   : > { %v1298_v41 = vadd.f32 1.0, %v1882_v40 }
 0x608   : > { %1885 = vrcp.f32 %v1298_v41 }
 0x60e   : > { %v1884_v45 = vpop.eup %1883 }
 0x60f   : > { %v1303_v42 = vmul.f32 %v1884_v45, %v1281_v24 }
 0x611   : > { %v1305_v48 = vmax.f32 %v1069_v47, %v1303_v42  ;;  %1315 = sbr.rel (!%p2426_p0) target bundleno = 1568 (0x620), region = 102 }
 0x612   : > { %v1886_v53 = vpop.eup %1885 }
 0x613   : > { %1307 = vst [vmem:[%s391_s22] sm:$0xff] %v1305_v48  ;;  %v1304_v54 = vmul.f32 %v1886_v53, %v1287_v50 }
 0x615   : > { %v1306_v51 = vmax.f32 %v1070_v49, %v1304_v54 }
 0x617   : > { %1308 = vst [vmem:[%s391_s22 + $0x8] sm:$0xff] %v1306_v51 }
 0x61a   : > { %v1347_v55 = vld [vmem:[%s391_s22] sm:$0xff] }
 0x61b   : > { %1348 = vst [vmem:[%s1317_s24] sm:$0xff] %v1347_v55 }
 0x61e   : > { %v1349_v59 = vld [vmem:[%s391_s22 + $0x8] sm:$0xff] }
 0x61f   : > { %1350 = vst [vmem:[%s1317_s24 + $0x10] sm:$0xff] %v1349_v59 }
 0x620 PF: > { %s2427_s25 = sld [smem:[#allocation10_spill]]  ;;  %p17_p1 = scmp.ge.s32.totalorder %s2044_s9, 4  }
 0x621   : > { %s2428_s27 = smov %s1969_s28  ;;  %s2430_s29 = smov %s2044_s9 }
 0x622   :  { %19 = sbr.rel (!%p17_p1) target bundleno = 3 (0x3), region = 172 }
 0x626   : > { %s2429_s28 = smov %s2427_s25 }
 0x629   :  { %1366 = vsyncpa [#allocation4], 1 }
 0x62a   :  { %1368 = vsyncpa [#allocation4 + $0x1], 1 }
 0x62b   :  { %1369 = vsyncpa [#allocation6], 1 }

</bundles_post_ra>
